<compile_context>
chip_gen: v7x
topology: tpu7x:2x2x1
jax: 0.10.0
libtpu: 0.0.40
codegen_flags: <defaults>
</compile_context>

<pallas_src>
import jax
import jax.numpy as jnp
from jax.experimental import pallas as pl
from jax.experimental.pallas import tpu as pltpu

IGNORE_INDEX = 0
BETA = 0.4          # the module hard-codes self.beta = 0.4 regardless of ctor arg
_NEG = -1e30        # class-dim pad value: behaves like -inf without producing NaNs


def _pcl_tile_kernel(s_ref, t_ref, lbl_ref, out_ref):
    """One row tile: emit this tile's (already beta-weighted) partial loss sum."""
    s = s_ref[...].astype(jnp.float32)            # (TB, Cp) student logits
    lbl = lbl_ref[...]                            # (TB, 1) int32 labels (-1 = padded row)
    TB, Cp = s.shape

    # --- student log_softmax over the lane (class) dim ---
    s_sh = s - jnp.max(s, axis=-1, keepdims=True)
    logq = s_sh - jnp.log(jnp.sum(jnp.exp(s_sh), axis=-1, keepdims=True))   # (TB, Cp)

    # --- supervised CE elements; int32/bool temporaries die before the teacher pass ---
    class_ids = jax.lax.broadcasted_iota(jnp.int32, (TB, Cp), 1)
    ce_elem = jnp.where(class_ids == lbl, -logq, 0.0)                       # (TB, Cp)

    # --- teacher softmax / log_softmax (reciprocal on EUP instead of full-tile divide) ---
    t = t_ref[...].astype(jnp.float32)
    t_sh = t - jnp.max(t, axis=-1, keepdims=True)
    t_exp = jnp.exp(t_sh)
    t_sum = jnp.sum(t_exp, axis=-1, keepdims=True)
    p = t_exp * pl.reciprocal(t_sum, approx=False)                          # (TB, Cp)
    logp = t_sh - jnp.log(t_sum)

    kl_elem = p * (logp - logq)                                             # (TB, Cp)

    # --- fused masked reduction ---
    # rows with label != ignore_index contribute (1-beta)*CE; rows with label == ignore
    # contribute beta*KL; padded rows (label = -1) match no one-hot lane -> contribute 0.
    valid = lbl != IGNORE_INDEX                                             # (TB, 1)
    contrib = jnp.where(valid, (1.0 - BETA) * ce_elem, BETA * kl_elem)
    out_ref[0, 0] = jnp.sum(contrib)


def _choose_row_tile(B, C_pad):
    # ~14 live f32 (TB, C_pad) tiles: 2 inputs x 2 pipeline buffers + ~10 temporaries.
    budget_bytes = 16 * 1024 * 1024          # fits default scoped VMEM on v5e/v6e/v7x
    per_row_bytes = 14 * C_pad * 4
    tb = (budget_bytes // per_row_bytes) // 8 * 8
    tb = max(8, min(256, tb))
    tb = min(tb, ((B + 7) // 8) * 8)         # don't over-pad tiny batches
    return tb


@jax.jit
def partial_consistency_loss(student_output, teacher_output, student_label):
    """student_output, teacher_output: (B, C) float (any dtype); student_label: (B,) int."""
    B, C = student_output.shape
    C_pad = ((C + 127) // 128) * 128         # lane-dense class dim
    tb = _choose_row_tile(B, C_pad)
    B_pad = ((B + tb - 1) // tb) * tb
    num_tiles = B_pad // tb

    pad_rows, pad_cols = B_pad - B, C_pad - C
    if pad_rows or pad_cols:
        # pads act like -inf logits; padded rows get label -1 so neither branch fires
        s_in = jnp.pad(student_output, ((0, pad_rows), (0, pad_cols)), constant_values=_NEG)
        t_in = jnp.pad(teacher_output, ((0, pad_rows), (0, pad_cols)), constant_values=_NEG)
    else:
        s_in, t_in = student_output, teacher_output
    lbl = jnp.pad(student_label.astype(jnp.int32), (0, pad_rows), constant_values=-1)
    lbl = lbl.reshape(B_pad, 1)

    partials = pl.pallas_call(
        _pcl_tile_kernel,
        out_shape=jax.ShapeDtypeStruct((num_tiles, 1), jnp.float32),
        grid=(num_tiles,),
        in_specs=[
            pl.BlockSpec((tb, C_pad), lambda i: (i, 0)),   # student tile (native dtype)
            pl.BlockSpec((tb, C_pad), lambda i: (i, 0)),   # teacher tile (native dtype)
            pl.BlockSpec((tb, 1), lambda i: (i, 0)),       # labels tile
        ],
        out_specs=pl.BlockSpec((1, 1), lambda i: (i, 0), memory_space=pltpu.SMEM),
        compiler_params=pltpu.CompilerParams(
            dimension_semantics=("parallel",)),            # row tiles are independent
    )(s_in, t_in, lbl)

    # tiny epilogue in JAX: sum per-tile partials, divide by the TRUE batch size
    return jnp.sum(partials) / jnp.float32(B)


def _reference_loss(s, t, lbl):
    # Pure-JAX reference mirroring the PyTorch semantics.
    logq = jax.nn.log_softmax(s, axis=-1)
    p = jax.nn.softmax(t, axis=-1)
    logp = jax.nn.log_softmax(t, axis=-1)
    valid = lbl != IGNORE_INDEX
    ce = -jnp.take_along_axis(logq, lbl[:, None], axis=-1)[:, 0]
    loss_s = jnp.sum(jnp.where(valid, ce, 0.0))
    kl = jnp.sum(p * (logp - logq), axis=-1)
    loss_u = jnp.sum(jnp.where(valid, 0.0, kl))
    return ((1.0 - BETA) * loss_s + BETA * loss_u) / s.shape[0]


if __name__ == "__main__":
    B, C = 8, 32  # small demo shapes (batch rows, num classes)
    key = jax.random.PRNGKey(0)
    k1, k2, k3 = jax.random.split(key, 3)

    student_logits = jax.random.normal(k1, (B, C), dtype=jnp.float32)
    teacher_logits = jax.random.normal(k2, (B, C), dtype=jnp.float32)
    labels = jax.random.randint(k3, (B,), 0, C, dtype=jnp.int32)
    # Make sure both branches are exercised.
    labels = labels.at[0].set(IGNORE_INDEX).at[3].set(IGNORE_INDEX).at[1].set(5)

    loss = partial_consistency_loss(student_logits, teacher_logits, labels)
    jax.block_until_ready(loss)

    ref = _reference_loss(student_logits, teacher_logits, labels)
    assert jnp.allclose(loss, ref, rtol=1e-5, atol=1e-5), (loss, ref)

    print("KERNEL_OK")
</pallas_src>

<mosaic_0001>
module attributes {stable_mosaic.version = 11 : i64} {
  func.func @_pcl_tile_kernel(%arg0: i32, %arg1: memref<8x128xf32, #tpu.memory_space<vmem>>, %arg2: memref<8x128xf32, #tpu.memory_space<vmem>>, %arg3: memref<8x1xi32, #tpu.memory_space<vmem>>, %arg4: memref<1x1xf32, #tpu.memory_space<smem>>) attributes {dimension_semantics = [#tpu.dimension_semantics<parallel>], iteration_bounds = array<i64: 1>, scalar_prefetch = 0 : i64, scratch_operands = 0 : i64, tpu.core_type = #tpu.core_type<tc>, window_params = [{transform_indices = @transform_0, window_bounds = array<i64: 8, 128>}, {transform_indices = @transform_1, window_bounds = array<i64: 8, 128>}, {transform_indices = @transform_2, window_bounds = array<i64: 8, 1>}, {transform_indices = @transform_3, window_bounds = array<i64: 1, 1>}]} {
    %c0 = arith.constant 0 : index
    %c0_0 = arith.constant 0 : index
    %0 = vector.load %arg1[%c0, %c0_0] : memref<8x128xf32, #tpu.memory_space<vmem>>, vector<8x128xf32>
    %c0_1 = arith.constant 0 : index
    %c0_2 = arith.constant 0 : index
    %1 = vector.load %arg3[%c0_1, %c0_2] : memref<8x1xi32, #tpu.memory_space<vmem>>, vector<8x1xi32>
    %cst = arith.constant dense<0xFF800000> : vector<8xf32>
    %2 = vector.multi_reduction <maximumf>, %0, %cst [1] : vector<8x128xf32> to vector<8xf32>
    %3 = vector.shape_cast %2 : vector<8xf32> to vector<8x1xf32>
    %4 = vector.broadcast %3 : vector<8x1xf32> to vector<8x128xf32>
    %5 = arith.subf %0, %4 : vector<8x128xf32>
    %6 = math.exp %5 : vector<8x128xf32>
    %cst_3 = arith.constant dense<0.000000e+00> : vector<8xf32>
    %7 = vector.multi_reduction <add>, %6, %cst_3 [1] : vector<8x128xf32> to vector<8xf32>
    %8 = vector.shape_cast %7 : vector<8xf32> to vector<8x1xf32>
    %9 = math.log %8 : vector<8x1xf32>
    %10 = vector.broadcast %9 : vector<8x1xf32> to vector<8x128xf32>
    %11 = arith.subf %5, %10 : vector<8x128xf32>
    %12 = tpu.iota {dimensions = array<i32: 1>} : vector<8x128xi32>
    %13 = vector.broadcast %1 : vector<8x1xi32> to vector<8x128xi32>
    %14 = arith.cmpi eq, %12, %13 : vector<8x128xi32>
    %cst_4 = arith.constant 0.000000e+00 : f32
    %15 = vector.broadcast %cst_4 : f32 to vector<8x128xf32>
    %16 = arith.subf %15, %11 : vector<8x128xf32>
    %cst_5 = arith.constant 0.000000e+00 : f32
    %17 = vector.broadcast %cst_5 : f32 to vector<8x128xf32>
    %18 = arith.select %14, %16, %17 : vector<8x128xi1>, vector<8x128xf32>
    %c0_6 = arith.constant 0 : index
    %c0_7 = arith.constant 0 : index
    %19 = vector.load %arg2[%c0_6, %c0_7] : memref<8x128xf32, #tpu.memory_space<vmem>>, vector<8x128xf32>
    %cst_8 = arith.constant dense<0xFF800000> : vector<8xf32>
    %20 = vector.multi_reduction <maximumf>, %19, %cst_8 [1] : vector<8x128xf32> to vector<8xf32>
    %21 = vector.shape_cast %20 : vector<8xf32> to vector<8x1xf32>
    %22 = vector.broadcast %21 : vector<8x1xf32> to vector<8x128xf32>
    %23 = arith.subf %19, %22 : vector<8x128xf32>
    %24 = math.exp %23 : vector<8x128xf32>
    %cst_9 = arith.constant dense<0.000000e+00> : vector<8xf32>
    %25 = vector.multi_reduction <add>, %24, %cst_9 [1] : vector<8x128xf32> to vector<8xf32>
    %26 = vector.shape_cast %25 : vector<8xf32> to vector<8x1xf32>
    %27 = tpu.reciprocal %26 : vector<8x1xf32> -> vector<8x1xf32>
    %28 = vector.broadcast %27 : vector<8x1xf32> to vector<8x128xf32>
    %29 = arith.mulf %24, %28 : vector<8x128xf32>
    %30 = math.log %26 : vector<8x1xf32>
    %31 = vector.broadcast %30 : vector<8x1xf32> to vector<8x128xf32>
    %32 = arith.subf %23, %31 : vector<8x128xf32>
    %33 = arith.subf %32, %11 : vector<8x128xf32>
    %34 = arith.mulf %29, %33 : vector<8x128xf32>
    %c0_i32 = arith.constant 0 : i32
    %35 = vector.broadcast %c0_i32 : i32 to vector<8x1xi32>
    %36 = arith.cmpi ne, %1, %35 : vector<8x1xi32>
    %cst_10 = arith.constant 6.000000e-01 : f32
    %37 = vector.broadcast %cst_10 : f32 to vector<8x128xf32>
    %38 = arith.mulf %37, %18 : vector<8x128xf32>
    %cst_11 = arith.constant 4.000000e-01 : f32
    %39 = vector.broadcast %cst_11 : f32 to vector<8x128xf32>
    %40 = arith.mulf %39, %34 : vector<8x128xf32>
    %41 = vector.shape_cast %36 : vector<8x1xi1> to vector<8x1xi1>
    %42 = vector.broadcast %41 : vector<8x1xi1> to vector<8x128xi1>
    %43 = arith.select %42, %38, %40 : vector<8x128xi1>, vector<8x128xf32>
    %44 = vector.shape_cast %43 : vector<8x128xf32> to vector<1x8x128xf32>
    %cst_12 = arith.constant dense<0.000000e+00> : vector<1xf32>
    %45 = vector.multi_reduction <add>, %44, %cst_12 [1, 2] : vector<1x8x128xf32> to vector<1xf32>
    %46 = vector.shape_cast %45 : vector<1xf32> to vector<1x1x1xf32>
    %47 = vector.extract %46[0, 0, 0] : f32 from vector<1x1x1xf32>
    %c0_13 = arith.constant 0 : index
    %c0_14 = arith.constant 0 : index
    %48 = memref.load %arg4[%c0_13, %c0_14] : memref<1x1xf32, #tpu.memory_space<smem>>
    memref.store %47, %arg4[%c0_13, %c0_14] : memref<1x1xf32, #tpu.memory_space<smem>>
    return
  }
  func.func @transform_0(%arg0: i32) -> (i32, i32) {
    %c0_i32 = arith.constant 0 : i32
    %c0_i32_0 = arith.constant 0 : i32
    return %arg0, %c0_i32 : i32, i32
  }
  func.func @transform_1(%arg0: i32) -> (i32, i32) {
    %c0_i32 = arith.constant 0 : i32
    %c0_i32_0 = arith.constant 0 : i32
    return %arg0, %c0_i32 : i32, i32
  }
  func.func @transform_2(%arg0: i32) -> (i32, i32) {
    %c0_i32 = arith.constant 0 : i32
    %c0_i32_0 = arith.constant 0 : i32
    return %arg0, %c0_i32 : i32, i32
  }
  func.func @transform_3(%arg0: i32) -> (i32, i32) {
    %c0_i32 = arith.constant 0 : i32
    %c0_i32_0 = arith.constant 0 : i32
    return %arg0, %c0_i32 : i32, i32
  }
}

</mosaic_0001>

<bundles_post_ra>
// kernel: partial_consistency_loss.1
= control target key start
LH: loop header
LB: loop body
LE: loop exit
PB: predicated region body
PF: predicated region fallthrough
CT: control target
= control target key end

     0   :  { %s154_s0 = inlined_call_operand.vmem [shape: f32[8,128], index: 0, kind: input, shape index: {}]   ;;  %s155_s1 = inlined_call_operand.vmem [shape: f32[8,128], index: 1, kind: input, shape index: {}]   ;;  %s156_s2 = inlined_call_operand.vmem [shape: s32[8,1], index: 2, kind: input, shape index: {}]   ;;  %s157_s3 = inlined_call_operand.hbm [shape: f32[1,1], index: 3, kind: output, shape index: {}]  }
   0x1   :  { %v15_v0 = vld [vmem:[%s154_s0] sm:$0xff] }
   0x2   :  { %8 = vsyncpa [#allocation3], 0  ;;  %17 = vmax.xlane.f32.xlu0 %v15_v0  ;;  %v35_v1 = vld [vmem:[%s155_s1] sm:$0xff]  ;;  %v111_v3 = vmov 0   ;;  %v27_v16 = vlaneseq  ;;  %s99_s18 = scalar_lea.hbm %s157_s3, 16 }
   0x3   :  { %v16_v2 = vld [vmem:[%s156_s2] sm:$0xff]  ;;  %87 = vset.pattern.permute.xlu0 %v111_v3  ;;  %88 = vset.pattern.permute.xlu1 %v111_v3  ;;  %p100_p0 = scmp.ne.s32.totalorder %s157_s3, %s99_s18  ;;  %p103_p1 = scmp.lt.u32.totalorder %s99_s18, %s157_s3 }
   0x4   :  { %vm50_vm0 = vcmp.ne.s32.totalorder %v16_v2, 0  ;;  %v28_v19 = vand.u32 127, %v27_v16 }
   0x5   :  { %v53_v4 = vsel %vm50_vm0, 1, %v111_v3  ;;  %p105_p2 = pnand %p103_p1, %p100_p0 }
   0x6   :  { %36 = vmax.xlane.f32.xlu0 %v35_v1 }
  0x1c   :  { %30 = vperm.xlu0 %87, %v16_v2  }
  0x8f   :  { %v18_v5 = vpop.xlane.xlu0 %17 }
  0x90   :  { %v19_v6 = vsub.f32 %v15_v0, %v18_v5 }
  0x92   :  { %v20_v7 = vmul.f32 1.442695, %v19_v6 }
  0x93   :  { %v37_v8 = vpop.xlane.xlu0 %36 }
  0x94   :  { %v38_v9 = vsub.f32 %v35_v1, %v37_v8  ;;  %89 = vpow2.f32 %v20_v7 }
  0x96   :  { %v39_v10 = vmul.f32 1.442695, %v38_v9 }
  0x98   :  { %91 = vpow2.f32 %v39_v10 }
  0x9b   :  { %v31_v21 = vpop.permute.xlu0 %30 }
  0x9c   :  { %vm32_vm1 = vcmp.eq.s32.totalorder %v28_v19, %v31_v21 }
  0x9e   :  { %v90_v11 = vpop.eup %89 }
  0x9f   :  { %22 = vadd.xlane.f32.xlu1 %v90_v11 }
  0xa2   :  { %v92_v12 = vpop.eup %91 }
  0xa3   :  { %41 = vadd.xlane.f32.xlu1 %v92_v12 }
  0xb4   :  { %55 = vperm.xlu1 %88, %v53_v4  }
 0x12c   :  { %v23_v13 = vpop.xlane.xlu1 %22 }
 0x12d   :  { %93 = vlog2.f32 %v23_v13 }
 0x130   :  { %v42_v14 = vpop.xlane.xlu1 %41 }
 0x131   :  { %95 = vlog2.f32 %v42_v14 }
 0x132   :  { %97 = vrcp.f32 %v42_v14 }
 0x134   :  { %v56_v26 = vpop.permute.xlu1 %55 }
 0x135   :  { %vm57_vm2 = vcmp.eq.s32.totalorder %v56_v26, 1 }
 0x137   :  { %v94_v15 = vpop.eup %93 }
 0x138   :  { %v25_v17 = vmul.f32 0.6931472, %v94_v15 }
 0x13a   :  { %v26_v18 = vsub.f32 %v19_v6, %v25_v17 }
 0x13b   :  { %v96_v20 = vpop.eup %95 }
 0x13c   :  { %v46_v22 = vmul.f32 0.6931472, %v96_v20  ;;  %v98_v23 = vpop.eup %97  ;;  %v33_v24 = vsub.f32 0.0, %v26_v18 }
 0x13d   :  { %v44_v27 = vmul.f32 %v98_v23, %v92_v12 }
 0x13e   :  { %v47_v25 = vsub.f32 %v38_v9, %v46_v22  ;;  %v34_v29 = vsel %vm32_vm1, %v33_v24, 0.0 }
 0x13f   :  { %v51_v31 = vmul.f32 0.6, %v34_v29 }
 0x140   :  { %v48_v28 = vsub.f32 %v47_v25, %v26_v18 }
 0x142   :  { %v49_v30 = vmul.f32 %v48_v28, %v44_v27 }
 0x144   :  { %v52_v32 = vmul.f32 0.4, %v49_v30 }
 0x146   :  { %v58_v33 = vsel %vm57_vm2, %v51_v31, %v52_v32 }
 0x147   :  { %59 = vadd.xlane.f32.xlu1 %v58_v33 }
 0x1d4   :  { %v60_v34 = vpop.xlane.xlu1 %59 }
 0x1d5   :  { %v61_v35 = vrot.slane %v60_v34, 4 }
 0x1d7   :  { %v62_v36 = vadd.f32 %v61_v35, %v60_v34 }
 0x1d9   :  { %v63_v37 = vrot.slane %v62_v36, 2 }
 0x1db   :  { %v64_v38 = vadd.f32 %v63_v37, %v62_v36 }
 0x1dd   :  { %v65_v39 = vrot.slane %v64_v38, 1 }
 0x1df   :  { %v66_v40 = vadd.f32 %v65_v39, %v64_v38 }
 0x1e1   :  { %83 = vpush %v66_v40 }
 0x212   :  { %s84_s0 = spop %83 }
 0x213   :  { %69 = sst [smem:[#allocation2]] %s84_s0 }
 0x214   :  { %108 = shalt.err (!%p105_p2)
}
 0x215   :  { %s112_s23 = smov [#allocation2]  }
 0x216   :  { %77 = dma.smem_to_hbm %s112_s23, 16, %s157_s3, [#allocation3]  }
 0x217   :  { %109 = dma.done.wait [#allocation3], 16  }
 0x218   :  { %110 = vsyncadd [#allocation3], 4294967280 }
 0x219   :  { %81 = sfence }
 0x21a   :  { %82 = vsyncpa [#allocation3], 1 }

</bundles_post_ra>
